<compile_context>
chip_gen: v7x
topology: tpu7x:2x2x1
jax: 0.10.0
libtpu: 0.0.40
codegen_flags: <defaults>
</compile_context>

<pallas_src>
import functools

import jax
import jax.numpy as jnp
from jax.experimental import pallas as pl
from jax.experimental.pallas import tpu as pltpu

IN_FEATURES = 68
HIDDEN = 256
MAX_TB = 4096  # keeps per-step VMEM well under v5e's 16 MiB default scoped limit


def _round_up(x, m):
    return ((x + m - 1) // m) * m


def _mlp_kernel(x_ref, w1_ref, b1_ref, w2_ref, b2_ref, o_ref):
    # fc1 on the MXU: bf16 operands, f32 accumulation -> (TB, 256) f32.
    h = jnp.dot(x_ref[...], w1_ref[...], preferred_element_type=jnp.float32)
    h = jnp.maximum(h + b1_ref[...], 0.0)
    # fc2 on the VPU/XLU: broadcast multiply by the (1, 256) weight row and
    # reduce over the lane axis -> (TB, 1).  Keeps MXU cycles for fc1 only.
    y = jnp.sum(h * w2_ref[...], axis=-1, keepdims=True)
    o_ref[...] = (y + b2_ref[0]).astype(o_ref.dtype)


def _choose_tile(batch, tb):
    """Round tb to a multiple of 128, cap at MAX_TB, prefer >= 2 grid tiles."""
    tb = _round_up(max(int(tb), 128), 128)
    tb = min(tb, MAX_TB)
    # Aim for at least two grid tiles (v7x has 2 TensorCores on the "parallel"
    # batch axis) whenever the batch is bigger than one tile.
    two_tile = _round_up(-(-batch // 2), 128)
    return max(128, min(tb, two_tile))


@functools.partial(jax.jit, static_argnames=("tb",))
def mlp_wo_room_type_forward(z, w1, b1, w2, b2, *, tb=MAX_TB):
    """z: (B, 68) f32. w1: (68, 256), b1: (256,), w2: (256, 1), b2: (1,).

    Returns (B,) f32 ~= fc2(relu(fc1(z))).view(-1) with bf16 fc1 operands and
    f32 accumulation."""
    B = z.shape[0]
    tb = _choose_tile(B, tb)
    padded_b = _round_up(B, tb)
    num_tiles = padded_b // tb
    if padded_b != B:
        z = jnp.pad(z, ((0, padded_b - B), (0, 0)))

    # bf16 for the two MXU operands (z dominates HBM traffic); f32 elsewhere.
    z_bf16 = z.astype(jnp.bfloat16)
    w1_bf16 = w1.astype(jnp.bfloat16)
    b1_2d = b1.reshape(1, HIDDEN).astype(jnp.float32)
    w2_row = w2.reshape(1, HIDDEN).astype(jnp.float32)   # (256, 1) -> (1, 256)
    b2_smem = b2.reshape(1).astype(jnp.float32)

    out = pl.pallas_call(
        _mlp_kernel,
        out_shape=jax.ShapeDtypeStruct((padded_b, 1), jnp.float32),
        grid=(num_tiles,),
        in_specs=[
            # streamed / double-buffered per batch tile
            pl.BlockSpec((tb, IN_FEATURES), lambda i: (i, 0)),
            # resident parameters (same block every step -> DMA'd once)
            pl.BlockSpec((IN_FEATURES, HIDDEN), lambda i: (0, 0)),
            pl.BlockSpec((1, HIDDEN), lambda i: (0, 0)),
            pl.BlockSpec((1, HIDDEN), lambda i: (0, 0)),
            # scalar fc2 bias in SMEM
            pl.BlockSpec(memory_space=pltpu.MemorySpace.SMEM),
        ],
        out_specs=pl.BlockSpec((tb, 1), lambda i: (i, 0)),
        compiler_params=pltpu.CompilerParams(
            dimension_semantics=("parallel",),
        ),
    )(z_bf16, w1_bf16, b1_2d, w2_row, b2_smem)

    # .view(-1): drop padded rows and flatten.
    return out.reshape(-1)[:B]


def init_params(key):
    """Deterministic synthetic params mirroring nn.Linear(68,256)/nn.Linear(256,1).

    Stored as (in, out) so no transpose is needed in the kernel."""
    k1, k2, k3, k4 = jax.random.split(key, 4)
    s1 = 1.0 / jnp.sqrt(jnp.float32(IN_FEATURES))
    s2 = 1.0 / jnp.sqrt(jnp.float32(HIDDEN))
    w1 = jax.random.uniform(k1, (IN_FEATURES, HIDDEN), jnp.float32, -s1, s1)
    b1 = jax.random.uniform(k2, (HIDDEN,), jnp.float32, -s1, s1)
    w2 = jax.random.uniform(k3, (HIDDEN, 1), jnp.float32, -s2, s2)
    b2 = jax.random.uniform(k4, (1,), jnp.float32, -s2, s2)
    return w1, b1, w2, b2


def _reference_matched(z, w1, b1, w2, b2):
    """Same numerics as the kernel: bf16 fc1 operands, f32 accumulation, f32 fc2."""
    h = jnp.dot(z.astype(jnp.bfloat16), w1.astype(jnp.bfloat16),
                preferred_element_type=jnp.float32)
    h = jnp.maximum(h + b1, 0.0)
    y = jnp.dot(h, w2, preferred_element_type=jnp.float32,
                precision=jax.lax.Precision.HIGHEST)
    return (y + b2).reshape(-1)


def _reference_f32(z, w1, b1, w2, b2):
    """Full-f32 PyTorch-equivalent reference (loose tolerance vs bf16 kernel)."""
    h = jnp.maximum(
        jnp.dot(z, w1, preferred_element_type=jnp.float32,
                precision=jax.lax.Precision.HIGHEST) + b1, 0.0)
    y = jnp.dot(h, w2, preferred_element_type=jnp.float32,
                precision=jax.lax.Precision.HIGHEST)
    return (y + b2).reshape(-1)


if __name__ == "__main__":
    key = jax.random.PRNGKey(0)
    kx, kp = jax.random.split(key)
    w1, b1, w2, b2 = init_params(kp)

    # Small batch: single-tile path (tb rounds up to 128, batch zero-padded).
    B1 = 16
    z1 = jax.random.normal(kx, (B1, IN_FEATURES), jnp.float32)
    y1 = mlp_wo_room_type_forward(z1, w1, b1, w2, b2)
    jax.block_until_ready(y1)
    assert y1.shape == (B1,)
    assert jnp.allclose(y1, _reference_matched(z1, w1, b1, w2, b2),
                        atol=1e-3, rtol=1e-3), "mismatch vs bf16-matched ref (single tile)"
    assert jnp.allclose(y1, _reference_f32(z1, w1, b1, w2, b2),
                        atol=5e-2, rtol=5e-2), "mismatch vs f32 ref (single tile)"

    # Larger ragged batch: 2 tiles of 256 (>=2 tiles for the two-TC path) plus
    # batch padding; exercises the multi-tile grid.
    B2 = 300
    z2 = jax.random.normal(jax.random.fold_in(kx, 1), (B2, IN_FEATURES), jnp.float32)
    y2 = mlp_wo_room_type_forward(z2, w1, b1, w2, b2)
    jax.block_until_ready(y2)
    assert y2.shape == (B2,)
    assert jnp.allclose(y2, _reference_matched(z2, w1, b1, w2, b2),
                        atol=1e-3, rtol=1e-3), "mismatch vs bf16-matched ref (multi tile)"
    assert jnp.allclose(y2, _reference_f32(z2, w1, b1, w2, b2),
                        atol=5e-2, rtol=5e-2), "mismatch vs f32 ref (multi tile)"

    print("KERNEL_OK")
</pallas_src>

<mosaic_0001>
module attributes {stable_mosaic.version = 11 : i64} {
  func.func @_mlp_kernel(%arg0: i32, %arg1: memref<128x68xbf16, #tpu.memory_space<vmem>>, %arg2: memref<68x256xbf16, #tpu.memory_space<vmem>>, %arg3: memref<1x256xf32, #tpu.memory_space<vmem>>, %arg4: memref<1x256xf32, #tpu.memory_space<vmem>>, %arg5: memref<1xf32, #tpu.memory_space<smem>>, %arg6: memref<128x1xf32, #tpu.memory_space<vmem>>) attributes {dimension_semantics = [#tpu.dimension_semantics<parallel>], iteration_bounds = array<i64: 1>, scalar_prefetch = 0 : i64, scratch_operands = 0 : i64, tpu.core_type = #tpu.core_type<tc>, window_params = [{transform_indices = @transform_0, window_bounds = array<i64: 128, 68>}, {pipeline_mode = #tpu.pipeline_mode<synchronous>, transform_indices = @transform_1, window_bounds = array<i64: 68, 256>}, {pipeline_mode = #tpu.pipeline_mode<synchronous>, transform_indices = @transform_2, window_bounds = array<i64: 1, 256>}, {pipeline_mode = #tpu.pipeline_mode<synchronous>, transform_indices = @transform_3, window_bounds = array<i64: 1, 256>}, {transform_indices = @transform_4, window_bounds = array<i64: 1>}, {transform_indices = @transform_5, window_bounds = array<i64: 128, 1>}]} {
    %c0 = arith.constant 0 : index
    %c0_0 = arith.constant 0 : index
    %0 = vector.load %arg1[%c0, %c0_0] : memref<128x68xbf16, #tpu.memory_space<vmem>>, vector<128x68xbf16>
    %c0_1 = arith.constant 0 : index
    %c0_2 = arith.constant 0 : index
    %1 = vector.load %arg2[%c0_1, %c0_2] : memref<68x256xbf16, #tpu.memory_space<vmem>>, vector<68x256xbf16>
    %cst = arith.constant dense<0.000000e+00> : vector<128x256xf32>
    %2 = tpu.matmul %0, %1, %cst {dimension_numbers = #tpu.dot_dimension_numbers<[1], [0], [0], [1], [0, 0, 1, 1], [], []>} : vector<128x68xbf16>, vector<68x256xbf16>, vector<128x256xf32> -> vector<128x256xf32>
    %c0_3 = arith.constant 0 : index
    %c0_4 = arith.constant 0 : index
    %3 = vector.load %arg3[%c0_3, %c0_4] : memref<1x256xf32, #tpu.memory_space<vmem>>, vector<1x256xf32>
    %4 = vector.broadcast %3 : vector<1x256xf32> to vector<128x256xf32>
    %5 = arith.addf %2, %4 : vector<128x256xf32>
    %cst_5 = arith.constant 0.000000e+00 : f32
    %6 = vector.broadcast %cst_5 : f32 to vector<128x256xf32>
    %7 = arith.maximumf %5, %6 : vector<128x256xf32>
    %c0_6 = arith.constant 0 : index
    %c0_7 = arith.constant 0 : index
    %8 = vector.load %arg4[%c0_6, %c0_7] : memref<1x256xf32, #tpu.memory_space<vmem>>, vector<1x256xf32>
    %9 = vector.broadcast %8 : vector<1x256xf32> to vector<128x256xf32>
    %10 = arith.mulf %7, %9 : vector<128x256xf32>
    %cst_8 = arith.constant dense<0.000000e+00> : vector<128xf32>
    %11 = vector.multi_reduction <add>, %10, %cst_8 [1] : vector<128x256xf32> to vector<128xf32>
    %12 = vector.shape_cast %11 : vector<128xf32> to vector<128x1xf32>
    %c0_9 = arith.constant 0 : index
    %13 = memref.load %arg5[%c0_9] : memref<1xf32, #tpu.memory_space<smem>>
    %14 = vector.broadcast %13 : f32 to vector<128x1xf32>
    %15 = arith.addf %12, %14 : vector<128x1xf32>
    %c0_10 = arith.constant 0 : index
    %c0_11 = arith.constant 0 : index
    %16 = vector.load %arg6[%c0_10, %c0_11] : memref<128x1xf32, #tpu.memory_space<vmem>>, vector<128x1xf32>
    tpu.vector_store %arg6[%c0_10, %c0_11], %15 {strides = array<i32>} : memref<128x1xf32, #tpu.memory_space<vmem>>, vector<128x1xf32>,
    return
  }
  func.func @transform_0(%arg0: i32) -> (i32, i32) {
    %c0_i32 = arith.constant 0 : i32
    %c0_i32_0 = arith.constant 0 : i32
    return %arg0, %c0_i32 : i32, i32
  }
  func.func @transform_1(%arg0: i32) -> (i32, i32) {
    %c0_i32 = arith.constant 0 : i32
    %c0_i32_0 = arith.constant 0 : i32
    %c0_i32_1 = arith.constant 0 : i32
    return %c0_i32, %c0_i32_0 : i32, i32
  }
  func.func @transform_2(%arg0: i32) -> (i32, i32) {
    %c0_i32 = arith.constant 0 : i32
    %c0_i32_0 = arith.constant 0 : i32
    %c0_i32_1 = arith.constant 0 : i32
    return %c0_i32, %c0_i32_0 : i32, i32
  }
  func.func @transform_3(%arg0: i32) -> (i32, i32) {
    %c0_i32 = arith.constant 0 : i32
    %c0_i32_0 = arith.constant 0 : i32
    %c0_i32_1 = arith.constant 0 : i32
    return %c0_i32, %c0_i32_0 : i32, i32
  }
  func.func @transform_4(%arg0: i32) -> i32 {
    %c0_i32 = arith.constant 0 : i32
    %c0_i32_0 = arith.constant 0 : i32
    return %c0_i32 : i32
  }
  func.func @transform_5(%arg0: i32) -> (i32, i32) {
    %c0_i32 = arith.constant 0 : i32
    %c0_i32_0 = arith.constant 0 : i32
    return %arg0, %c0_i32 : i32, i32
  }
}

</mosaic_0001>

<bundles_post_ra>
// kernel: mlp_wo_room_type_forward.1
= control target key start
LH: loop header
LB: loop body
LE: loop exit
PB: predicated region body
PF: predicated region fallthrough
CT: control target
= control target key end

     0   :  { %v512_v1 = vmov 0   ;;  %vm169_vm0 = vcmask 1041408   ;;  %vm144_vm1 = vcmask 556032   ;;  %v49_v21 = vlaneseq  ;;  %s747_s1 = inlined_call_operand.vmem [shape: bf16[68,256], index: 1, kind: input, shape index: {}]   ;;  %s748_s0 = inlined_call_operand.vmem [shape: bf16[128,68], index: 0, kind: input, shape index: {}]   ;;  %s749_s2 = inlined_call_operand.vmem [shape: f32[1,256], index: 2, kind: input, shape index: {}]   ;;  %s750_s3 = inlined_call_operand.vmem [shape: f32[1,256], index: 3, kind: input, shape index: {}]   ;;  %s751_s4 = inlined_call_operand.<no memory space> [shape: f32[1], index: 4, kind: input, shape index: {}]   ;;  %s752_s5 = inlined_call_operand.vmem [shape: f32[128,1], index: 5, kind: output, shape index: {}]  }
   0x1   :  { %v490_v0 = vld [vmem:[%s747_s1 + $0x4] ss:$8 sps:$4 sm:$0xff]   ;;  %208 = vmatprep.mubr.bf16.mxu0 %v512_v1  ;;  %248 = vmatprep.mubr.bf16.mxu1 %v512_v1  ;;  %v492_v2 = vld [vmem:[%s747_s1] ss:$8 sps:$4 sm:$0xff]   ;;  %v493_v3 = vld [vmem:[%s747_s1 + $0x14] ss:$8 sps:$4 sm:$0xff]  }
   0x2   :  { %176 = vmatprep.subr.bf16.mxu0 %v490_v0  ;;  %479 = vmatprep.subr.bf16.mxu1 %v490_v0  ;;  %v495_v4 = vld [vmem:[%s747_s1 + $0x10] ss:$8 sps:$4 sm:$0xff]   ;;  %v496_v5 = vld [vmem:[%s747_s1 + $0x24] ss:$8 sps:$4 sm:$0xff]   ;;  %v498_v6 = vld [vmem:[%s747_s1 + $0x20] ss:$8 sps:$4 sm:$0xff]  }
   0x3   :  { %177 = vmatpush1.bf16.msra.mxu0 %v492_v2  ;;  %484 = vmatpush1.bf16.msra.mxu1 %v492_v2  ;;  %v499_v7 = vld [vmem:[%s747_s1 + $0x34] ss:$8 sps:$4 sm:$0xff]   ;;  %v46_v8 = vld [vmem:[%s747_s1 + $0x40] sm:$0x33]  ;;  %v501_v9 = vld [vmem:[%s747_s1 + $0x30] ss:$8 sps:$4 sm:$0xff]  }
   0x4   :  { %178 = vmatprep.subr.bf16.mxu0 %v493_v3  ;;  %480 = vmatprep.subr.bf16.mxu1 %v493_v3  ;;  %v469_v10 = vcombine.high %v46_v8, %v46_v8  ;;  %v468_v11 = vcombine.low %v46_v8, %v46_v8  ;;  %v504_v13 = vld [vmem:[%s748_s0] sm:$0xff]   ;;  %v506_v15 = vld [vmem:[%s748_s0 + $0x8] sm:$0xff]   ;;  %v508_v17 = vld [vmem:[%s748_s0 + $0x10] sm:$0xff]   ;;  %v50_v22 = vshrl.u32 %v49_v21, 7  ;;  %vm431_vm2 = vcmask 7168  }
   0x5   :  { %v505_v14 = vld [vmem:[%s748_s0 + $0x20] sm:$0xff]   ;;  %v507_v16 = vld [vmem:[%s748_s0 + $0x28] sm:$0xff]   ;;  %v509_v18 = vld [vmem:[%s748_s0 + $0x30] sm:$0xff]  }
   0x6   :  { %v171_v12 = vsel %vm169_vm0, %v468_v11, 0  ;;  %v510_v19 = vld [vmem:[%s748_s0 + $0x18] sm:$0xff]   ;;  %v51_v23 = vsub.s32 0, %v50_v22  ;;  %v47_v24 = vld [vmem:[%s749_s2] sm:$0x3]  ;;  %v55_v25 = vsub.s32 1, %v50_v22 }
   0x7   :  { %179 = vmatpush1.bf16.msra.mxu0 %v495_v4  ;;  %485 = vmatpush1.bf16.msra.mxu1 %v495_v4  ;;  %v511_v20 = vld [vmem:[%s748_s0 + $0x38] sm:$0xff]   ;;  %v321_v27 = vld [vmem:[%s750_s3] sm:$0x3] }
   0x8   :  { %180 = vmatprep.subr.bf16.mxu0 %v496_v5  ;;  %481 = vmatprep.subr.bf16.mxu1 %v496_v5  ;;  %v605_v26 = vrot.slane %v47_v24, %v51_v23  ;;  %v610_v28 = vrot.slane %v47_v24, %v55_v25  ;;  %v614_v33 = vrot.slane %v321_v27, %v51_v23 }
   0x9   :  { %v618_v38 = vrot.slane %v321_v27, %v55_v25 }
   0xb   :  { %181 = vmatpush1.bf16.msra.mxu0 %v498_v6  ;;  %486 = vmatpush1.bf16.msra.mxu1 %v498_v6 }
   0xc   :  { %182 = vmatprep.subr.bf16.mxu0 %v499_v7  ;;  %482 = vmatprep.subr.bf16.mxu1 %v499_v7 }
   0xf   :  { %183 = vmatpush1.bf16.msra.mxu0 %v501_v9  ;;  %487 = vmatpush1.bf16.msra.mxu1 %v501_v9 }
  0x10   :  { %470 = vmatprep.subr.msk.bf16.mxu0 %vm169_vm0, %v469_v10  ;;  %483 = vmatprep.subr.msk.bf16.mxu1 %vm169_vm0, %v469_v10 }
  0x13   :  { %185 = vmatpush1.bf16.msra.mxu0 %v171_v12  ;;  %488 = vmatpush1.bf16.msra.mxu1 %v171_v12 }
  0x16   :  { %471 = vmatmul.mubr.msk.bf16.vlgmr.msra.gmra.mrb[0].mxu0 %vm144_vm1, %v504_v13  ;;  %475 = vmatmul.mubr.msk.bf16.vlgmr.msra.gmra.mrb[0].mxu1 %vm144_vm1, %v505_v14 }
  0x17   :  { %218 = vmatprep.mubr.bf16.mxu0 %v512_v1  ;;  %258 = vmatprep.mubr.bf16.mxu1 %v512_v1 }
  0x1e   :  { %472 = vmatmul.mubr.msk.bf16.gmra.mrb[4].mxu0 %vm144_vm1, %v506_v15  ;;  %476 = vmatmul.mubr.msk.bf16.gmra.mrb[4].mxu1 %vm144_vm1, %v507_v16 }
  0x1f   :  { %228 = vmatprep.mubr.bf16.mxu0 %v512_v1  ;;  %268 = vmatprep.mubr.bf16.mxu1 %v512_v1 }
  0x26   :  { %473 = vmatmul.mubr.msk.bf16.gmra.mrb[8].mxu0 %vm144_vm1, %v508_v17  ;;  %477 = vmatmul.mubr.msk.bf16.gmra.mrb[8].mxu1 %vm144_vm1, %v509_v18 }
  0x27   :  { %238 = vmatprep.mubr.bf16.mxu0 %v512_v1  ;;  %278 = vmatprep.mubr.bf16.mxu1 %v512_v1 }
  0x2e   :  { %474 = vmatmul.mubr.msk.bf16.gmra.mrb[12].mxu0 %vm144_vm1, %v510_v19  ;;  %478 = vmatmul.mubr.msk.bf16.gmra.mrb[12].mxu1 %vm144_vm1, %v511_v20 }
  0xe9   :  { %v210_v29 = vpop.f32.mrb[0].mxu0  ;;  %v250_v30 = vpop.f32.mrb[0].mxu1 }
  0xea   :  { %v211_v31 = vadd.f32 %v210_v29, %v605_v26  ;;  %v251_v32 = vadd.f32 %v250_v30, %v605_v26  ;;  %v212_v34 = vpop.f32.mrb[1].mxu0  ;;  %v252_v35 = vpop.f32.mrb[1].mxu1 }
  0xeb   :  { %v213_v36 = vadd.f32 %v212_v34, %v610_v28  ;;  %v253_v37 = vadd.f32 %v252_v35, %v610_v28  ;;  %v214_v39 = vpop.f32.mrb[2].mxu0  ;;  %v254_v40 = vpop.f32.mrb[2].mxu1 }
  0xec   :  { %v289_v41 = vmax.f32 %v211_v31, 0.0  ;;  %v305_v42 = vmax.f32 %v251_v32, 0.0  ;;  %v215_v43 = vadd.f32 %v214_v39, %v605_v26  ;;  %v255_v44 = vadd.f32 %v254_v40, %v605_v26  ;;  %v216_v45 = vpop.f32.mrb[3].mxu0  ;;  %v256_v46 = vpop.f32.mrb[3].mxu1 }
  0xed   :  { %v290_v47 = vmax.f32 %v213_v36, 0.0  ;;  %v306_v48 = vmax.f32 %v253_v37, 0.0  ;;  %v217_v49 = vadd.f32 %v216_v45, %v610_v28  ;;  %v257_v50 = vadd.f32 %v256_v46, %v610_v28 }
  0xee   :  { %v349_v51 = vmul.f32 %v614_v33, %v305_v42  ;;  %v291_v52 = vmax.f32 %v215_v43, 0.0  ;;  %v307_v53 = vmax.f32 %v255_v44, 0.0  ;;  %v333_v54 = vmul.f32 %v614_v33, %v289_v41 }
  0xef   :  { %v350_v55 = vmul.f32 %v618_v38, %v306_v48  ;;  %v292_v56 = vmax.f32 %v217_v49, 0.0  ;;  %v308_v57 = vmax.f32 %v257_v50, 0.0  ;;  %v334_v58 = vmul.f32 %v618_v38, %v290_v47 }
  0xf0   :  { %v335_v59 = vmul.f32 %v614_v33, %v291_v52  ;;  %v351_v60 = vmul.f32 %v614_v33, %v307_v53 }
  0xf1   :  { %v336_v61 = vmul.f32 %v618_v38, %v292_v56  ;;  %v220_v62 = vpop.f32.mrb[4].mxu0  ;;  %v365_v63 = vadd.f32 %v334_v58, %v333_v54  ;;  %v260_v0 = vpop.f32.mrb[4].mxu1  ;;  %v352_v1 = vmul.f32 %v618_v38, %v308_v57  ;;  %v389_v2 = vadd.f32 %v350_v55, %v349_v51 }
  0xf2   :  { %v221_v3 = vadd.f32 %v220_v62, %v605_v26  ;;  %v222_v4 = vpop.f32.mrb[5].mxu0  ;;  %v261_v5 = vadd.f32 %v260_v0, %v605_v26  ;;  %v262_v6 = vpop.f32.mrb[5].mxu1 }
  0xf3   :  { %v223_v7 = vadd.f32 %v222_v4, %v610_v28  ;;  %v224_v8 = vpop.f32.mrb[6].mxu0  ;;  %366 = vadd.xlane.f32.xlu0 %v365_v63  ;;  %v263_v9 = vadd.f32 %v262_v6, %v610_v28  ;;  %v392_v10 = vadd.f32 %v352_v1, %v351_v60  ;;  %v264_v11 = vpop.f32.mrb[6].mxu1  ;;  %v368_v12 = vadd.f32 %v336_v61, %v335_v59 }
  0xf4   :  { %v293_v13 = vmax.f32 %v221_v3, 0.0  ;;  %v225_v14 = vadd.f32 %v224_v8, %v605_v26  ;;  %v226_v15 = vpop.f32.mrb[7].mxu0  ;;  %v309_v16 = vmax.f32 %v261_v5, 0.0  ;;  %v265_v17 = vadd.f32 %v264_v11, %v605_v26  ;;  %v266_v18 = vpop.f32.mrb[7].mxu1 }
  0xf5   :  { %v294_v19 = vmax.f32 %v223_v7, 0.0  ;;  %v227_v20 = vadd.f32 %v226_v15, %v610_v28  ;;  %v310_v21 = vmax.f32 %v263_v9, 0.0  ;;  %393 = vadd.xlane.f32.xlu1 %v392_v10  ;;  %v267_v22 = vadd.f32 %v266_v18, %v610_v28 }
  0xf6   :  { %v337_v23 = vmul.f32 %v614_v33, %v293_v13  ;;  %v295_v24 = vmax.f32 %v225_v14, 0.0  ;;  %v353_v25 = vmul.f32 %v614_v33, %v309_v16  ;;  %v311_v27 = vmax.f32 %v265_v17, 0.0 }
  0xf7   :  { %v338_v29 = vmul.f32 %v618_v38, %v294_v19  ;;  %v296_v30 = vmax.f32 %v227_v20, 0.0  ;;  %v354_v31 = vmul.f32 %v618_v38, %v310_v21  ;;  %v312_v32 = vmax.f32 %v267_v22, 0.0  ;;  %390 = vadd.xlane.f32.xlu0 %v389_v2 }
  0xf8   :  { %v339_v34 = vmul.f32 %v614_v33, %v295_v24  ;;  %v355_v41 = vmul.f32 %v614_v33, %v311_v27 }
  0xf9   :  { %v340_v35 = vmul.f32 %v618_v38, %v296_v30  ;;  %v230_v36 = vpop.f32.mrb[8].mxu0  ;;  %v371_v37 = vadd.f32 %v338_v29, %v337_v23  ;;  %v270_v39 = vpop.f32.mrb[8].mxu1  ;;  %v395_v40 = vadd.f32 %v354_v31, %v353_v25  ;;  %v356_v42 = vmul.f32 %v618_v38, %v312_v32 }
  0xfa   :  { %v231_v43 = vadd.f32 %v230_v36, %v605_v26  ;;  %v232_v44 = vpop.f32.mrb[9].mxu0  ;;  %v271_v45 = vadd.f32 %v270_v39, %v605_v26  ;;  %v272_v46 = vpop.f32.mrb[9].mxu1 }
  0xfb   :  { %v233_v47 = vadd.f32 %v232_v44, %v610_v28  ;;  %v234_v48 = vpop.f32.mrb[10].mxu0  ;;  %372 = vadd.xlane.f32.xlu1 %v371_v37  ;;  %369 = vadd.xlane.f32.xlu0 %v368_v12  ;;  %v273_v49 = vadd.f32 %v272_v46, %v610_v28  ;;  %v274_v50 = vpop.f32.mrb[10].mxu1  ;;  %v374_v51 = vadd.f32 %v340_v35, %v339_v34 }
  0xfc   :  { %v297_v52 = vmax.f32 %v231_v43, 0.0  ;;  %v235_v53 = vadd.f32 %v234_v48, %v605_v26  ;;  %v236_v54 = vpop.f32.mrb[11].mxu0  ;;  %v313_v55 = vmax.f32 %v271_v45, 0.0  ;;  %v275_v56 = vadd.f32 %v274_v50, %v605_v26  ;;  %v276_v57 = vpop.f32.mrb[11].mxu1 }
  0xfd   :  { %v298_v58 = vmax.f32 %v233_v47, 0.0  ;;  %v237_v59 = vadd.f32 %v236_v54, %v610_v28  ;;  %v314_v60 = vmax.f32 %v273_v49, 0.0  ;;  %v277_v61 = vadd.f32 %v276_v57, %v610_v28 }
  0xfe   :  { %v341_v62 = vmul.f32 %v614_v33, %v297_v52  ;;  %v299_v63 = vmax.f32 %v235_v53, 0.0  ;;  %v357_v0 = vmul.f32 %v614_v33, %v313_v55  ;;  %v315_v1 = vmax.f32 %v275_v56, 0.0 }
  0xff   :  { %v342_v2 = vmul.f32 %v618_v38, %v298_v58  ;;  %v300_v3 = vmax.f32 %v237_v59, 0.0  ;;  %v358_v4 = vmul.f32 %v618_v38, %v314_v60  ;;  %v316_v5 = vmax.f32 %v277_v61, 0.0  ;;  %375 = vadd.xlane.f32.xlu1 %v374_v51  ;;  %396 = vadd.xlane.f32.xlu0 %v395_v40 }
 0x100   :  { %v343_v6 = vmul.f32 %v614_v33, %v299_v63  ;;  %v398_v7 = vadd.f32 %v356_v42, %v355_v41  ;;  %v359_v13 = vmul.f32 %v614_v33, %v315_v1  ;;  %v414_v53 = vstv %s751_s4 }
 0x101   :  { %v344_v8 = vmul.f32 %v618_v38, %v300_v3  ;;  %v240_v9 = vpop.f32.mrb[12].mxu0  ;;  %v280_v10 = vpop.f32.mrb[12].mxu1  ;;  %v377_v11 = vadd.f32 %v342_v2, %v341_v62  ;;  %v401_v12 = vadd.f32 %v358_v4, %v357_v0  ;;  %v360_v14 = vmul.f32 %v618_v38, %v316_v5 }
 0x102   :  { %v241_v15 = vadd.f32 %v240_v9, %v605_v26  ;;  %v242_v16 = vpop.f32.mrb[13].mxu0  ;;  %v281_v17 = vadd.f32 %v280_v10, %v605_v26  ;;  %v282_v18 = vpop.f32.mrb[13].mxu1 }
 0x103   :  { %v243_v19 = vadd.f32 %v242_v16, %v610_v28  ;;  %v244_v20 = vpop.f32.mrb[14].mxu0  ;;  %399 = vadd.xlane.f32.xlu1 %v398_v7  ;;  %378 = vadd.xlane.f32.xlu0 %v377_v11  ;;  %v283_v21 = vadd.f32 %v282_v18, %v610_v28  ;;  %v284_v22 = vpop.f32.mrb[14].mxu1  ;;  %v380_v23 = vadd.f32 %v344_v8, %v343_v6 }
 0x104   :  { %v301_v24 = vmax.f32 %v241_v15, 0.0  ;;  %v245_v25 = vadd.f32 %v244_v20, %v605_v26  ;;  %v246_v27 = vpop.f32.mrb[15].mxu0  ;;  %v317_v29 = vmax.f32 %v281_v17, 0.0  ;;  %v285_v30 = vadd.f32 %v284_v22, %v605_v26  ;;  %v286_v31 = vpop.f32.mrb[15].mxu1 }
 0x105   :  { %v302_v32 = vmax.f32 %v243_v19, 0.0  ;;  %v247_v34 = vadd.f32 %v246_v27, %v610_v28  ;;  %v318_v35 = vmax.f32 %v283_v21, 0.0  ;;  %v287_v36 = vadd.f32 %v286_v31, %v610_v28 }
 0x106   :  { %v345_v37 = vmul.f32 %v614_v33, %v301_v24  ;;  %v303_v39 = vmax.f32 %v245_v25, 0.0  ;;  %v361_v40 = vmul.f32 %v614_v33, %v317_v29  ;;  %v319_v41 = vmax.f32 %v285_v30, 0.0 }
 0x107   :  { %v346_v42 = vmul.f32 %v618_v38, %v302_v32  ;;  %v304_v43 = vmax.f32 %v247_v34, 0.0  ;;  %v362_v44 = vmul.f32 %v618_v38, %v318_v35  ;;  %v320_v45 = vmax.f32 %v287_v36, 0.0  ;;  %381 = vadd.xlane.f32.xlu1 %v380_v23  ;;  %402 = vadd.xlane.f32.xlu0 %v401_v12 }
 0x108   :  { %v347_v26 = vmul.f32 %v614_v33, %v303_v39  ;;  %v363_v46 = vmul.f32 %v614_v33, %v319_v41  ;;  %v404_v47 = vadd.f32 %v360_v14, %v359_v13 }
 0x109   :  { %v348_v28 = vmul.f32 %v618_v38, %v304_v43  ;;  %v364_v48 = vmul.f32 %v618_v38, %v320_v45  ;;  %v383_v49 = vadd.f32 %v346_v42, %v345_v37  ;;  %v407_v50 = vadd.f32 %v362_v44, %v361_v40 }
 0x10b   :  { %405 = vadd.xlane.f32.xlu1 %v404_v47  ;;  %384 = vadd.xlane.f32.xlu0 %v383_v49  ;;  %v386_v51 = vadd.f32 %v348_v28, %v347_v26  ;;  %v410_v52 = vadd.f32 %v364_v48, %v363_v46 }
 0x10f   :  { %387 = vadd.xlane.f32.xlu1 %v386_v51  ;;  %408 = vadd.xlane.f32.xlu0 %v407_v50 }
 0x113   :  { %411 = vadd.xlane.f32.xlu1 %v410_v52 }
 0x180   :  { %v367_v33 = vpop.xlane.xlu0 %366 }
 0x181   :  { %v415_v54 = vadd.f32 %v414_v53, %v367_v33 }
 0x182   :  { %v394_v55 = vpop.xlane.xlu1 %393 }
 0x183   :  { %432 = vst.msk [vmem:[%s752_s5] sm:$0xff] %vm431_vm2, %v415_v54  ;;  %v424_v38 = vadd.f32 %v414_v53, %v394_v55 }
 0x184   :  { %v391_v56 = vpop.xlane.xlu0 %390 }
 0x185   :  { %441 = vst.msk [vmem:[%s752_s5 + $0x48] sm:$0xff] %vm431_vm2, %v424_v38  ;;  %v423_v57 = vadd.f32 %v414_v53, %v391_v56 }
 0x187   :  { %440 = vst.msk [vmem:[%s752_s5 + $0x40] sm:$0xff] %vm431_vm2, %v423_v57 }
 0x188   :  { %v373_v58 = vpop.xlane.xlu1 %372  ;;  %v370_v59 = vpop.xlane.xlu0 %369 }
 0x189   :  { %v417_v60 = vadd.f32 %v414_v53, %v373_v58  ;;  %v416_v61 = vadd.f32 %v414_v53, %v370_v59 }
 0x18b   :  { %434 = vst.msk [vmem:[%s752_s5 + $0x10] sm:$0xff] %vm431_vm2, %v417_v60  ;;  %433 = vst.msk [vmem:[%s752_s5 + $0x8] sm:$0xff] %vm431_vm2, %v416_v61 }
 0x18c   :  { %v376_v62 = vpop.xlane.xlu1 %375  ;;  %v397_v63 = vpop.xlane.xlu0 %396 }
 0x18d   :  { %v418_v0 = vadd.f32 %v414_v53, %v376_v62  ;;  %v425_v1 = vadd.f32 %v414_v53, %v397_v63 }
 0x18f   :  { %435 = vst.msk [vmem:[%s752_s5 + $0x18] sm:$0xff] %vm431_vm2, %v418_v0  ;;  %442 = vst.msk [vmem:[%s752_s5 + $0x50] sm:$0xff] %vm431_vm2, %v425_v1 }
 0x190   :  { %v400_v2 = vpop.xlane.xlu1 %399  ;;  %v379_v3 = vpop.xlane.xlu0 %378 }
 0x191   :  { %v426_v4 = vadd.f32 %v414_v53, %v400_v2  ;;  %v419_v5 = vadd.f32 %v414_v53, %v379_v3 }
 0x193   :  { %443 = vst.msk [vmem:[%s752_s5 + $0x58] sm:$0xff] %vm431_vm2, %v426_v4  ;;  %436 = vst.msk [vmem:[%s752_s5 + $0x20] sm:$0xff] %vm431_vm2, %v419_v5 }
 0x194   :  { %v382_v6 = vpop.xlane.xlu1 %381  ;;  %v403_v7 = vpop.xlane.xlu0 %402 }
 0x195   :  { %v420_v8 = vadd.f32 %v414_v53, %v382_v6  ;;  %v427_v9 = vadd.f32 %v414_v53, %v403_v7 }
 0x197   :  { %437 = vst.msk [vmem:[%s752_s5 + $0x28] sm:$0xff] %vm431_vm2, %v420_v8  ;;  %444 = vst.msk [vmem:[%s752_s5 + $0x60] sm:$0xff] %vm431_vm2, %v427_v9 }
 0x198   :  { %v406_v10 = vpop.xlane.xlu1 %405  ;;  %v385_v11 = vpop.xlane.xlu0 %384 }
 0x199   :  { %v428_v12 = vadd.f32 %v414_v53, %v406_v10  ;;  %v421_v13 = vadd.f32 %v414_v53, %v385_v11 }
 0x19b   :  { %445 = vst.msk [vmem:[%s752_s5 + $0x68] sm:$0xff] %vm431_vm2, %v428_v12  ;;  %438 = vst.msk [vmem:[%s752_s5 + $0x30] sm:$0xff] %vm431_vm2, %v421_v13 }
 0x19c   :  { %v388_v14 = vpop.xlane.xlu1 %387  ;;  %v409_v15 = vpop.xlane.xlu0 %408 }
 0x19d   :  { %v422_v16 = vadd.f32 %v414_v53, %v388_v14  ;;  %v429_v17 = vadd.f32 %v414_v53, %v409_v15 }
 0x19f   :  { %439 = vst.msk [vmem:[%s752_s5 + $0x38] sm:$0xff] %vm431_vm2, %v422_v16  ;;  %446 = vst.msk [vmem:[%s752_s5 + $0x70] sm:$0xff] %vm431_vm2, %v429_v17 }
 0x1a0   :  { %v412_v18 = vpop.xlane.xlu1 %411 }
 0x1a1   :  { %v430_v19 = vadd.f32 %v414_v53, %v412_v18 }
 0x1a3   :  { %447 = vst.msk [vmem:[%s752_s5 + $0x78] sm:$0xff] %vm431_vm2, %v430_v19 }

</bundles_post_ra>
